<compile_context>
chip_gen: v5e
topology: v5e:2x2
jax: 0.10.0
libtpu: 0.0.40
codegen_flags: <defaults>
</compile_context>

<pallas_src>
import jax
import jax.numpy as jnp
from jax.experimental import pallas as pl
from jax.experimental.pallas import tpu as pltpu


def _round_up(a, b):
    return (a + b - 1) // b * b


def _cdiv(a, b):
    return (a + b - 1) // b


def _vmem_budget_bytes():
    """Generation-aware VMEM budget (keep ~15% headroom for the compiler)."""
    try:
        cap = int(getattr(pltpu.get_tpu_info(), "vmem_capacity_bytes",
                          64 * 1024 * 1024))
        if cap <= 0:
            cap = 64 * 1024 * 1024
    except Exception:
        cap = 64 * 1024 * 1024          # conservative: v7x per-TensorCore VMEM
    return int(cap * 0.85)


def _fast_per_row_bytes(d_in, d_out_pad):
    # double-buffered f32 x tile + double-buffered out tile
    # + in-kernel temporaries (bf16 x copy, f32 logits, f32 exp, slack).
    return 2 * 4 * d_in + 2 * 4 * d_out_pad + 2 * d_in + 4 * 4 * d_out_pad


# --------------------------------------------------------------------------
# Fast path: whole (pre-transposed) weight resident in VMEM, row-tiled grid.
# --------------------------------------------------------------------------
def _mlp_fast_kernel(x_ref, w_ref, b_ref, o_ref):
    # x_ref: [tm, D_in] f32; w_ref: [D_in, D_out_pad] bf16 (pre-transposed);
    # b_ref: [1, D_out_pad] f32; o_ref: [tm, D_out_pad].
    x = x_ref[...].astype(jnp.bfloat16)                       # bf16 MXU operand
    logits = jnp.dot(x, w_ref[...],
                     preferred_element_type=jnp.float32) + b_ref[...]
    # Numerically-stable log_softmax along the lane (class) axis.
    m = jnp.max(logits, axis=-1, keepdims=True)
    lse = m + jnp.log(jnp.sum(jnp.exp(logits - m), axis=-1, keepdims=True))
    o_ref[...] = (logits - lse).astype(o_ref.dtype)


def _mlp_fast(x, weight, bias, n, d_in, d_out, d_out_pad, budget, out_dtype):
    per_row = _fast_per_row_bytes(d_in, d_out_pad)
    w_bytes = d_in * d_out_pad * 2                 # bf16, single-buffered
    avail = max(budget - w_bytes - 4 * d_out_pad, 8 * per_row)
    tm_cap = max(8, min(1024, (avail // per_row) // 8 * 8))

    # Balanced row tiles (bounded padding); >=2 steps when there is enough
    # work to shard the "parallel" row axis across v7x's two TensorCores.
    min_tiles = max(1, min(8, _cdiv(n, 256)))
    n_tiles = max(_cdiv(n, tm_cap), min_tiles)
    tm = _round_up(_cdiv(n, n_tiles), 8)
    n_tiles = _cdiv(n, tm)
    n_pad = n_tiles * tm

    x_p = jnp.pad(x, ((0, n_pad - n), (0, 0))) if n_pad != n else x
    # Transpose + pad + bf16-cast the weight once (single fused wrapper pass).
    w_p = jnp.pad(weight.astype(jnp.bfloat16).T,
                  ((0, 0), (0, d_out_pad - d_out)))
    # Padded classes: -1e30 bias -> they lose the row max and exp underflows.
    b_p = jnp.full((1, d_out_pad), -1e30, dtype=jnp.float32)
    b_p = b_p.at[0, :d_out].set(bias.astype(jnp.float32))

    out_bytes = jnp.dtype(out_dtype).itemsize
    footprint = w_bytes + 4 * d_out_pad + tm * per_row
    vmem_limit = int(min(budget, max(footprint + (4 << 20), 32 << 20)))

    cost = pl.CostEstimate(
        flops=2 * n_pad * d_in * d_out_pad,
        transcendentals=n_pad * (d_out_pad + 1),
        bytes_accessed=(x_p.size * 4 + w_p.size * 2 + b_p.size * 4
                        + n_pad * d_out_pad * out_bytes),
    )

    def call(single_buffer):
        if single_buffer:
            # Resident weight/bias: one buffer is enough (constant index_map).
            w_spec = pl.BlockSpec((d_in, d_out_pad), lambda i: (0, 0),
                                  pipeline_mode=pl.Buffered(1))
            b_spec = pl.BlockSpec((1, d_out_pad), lambda i: (0, 0),
                                  pipeline_mode=pl.Buffered(1))
        else:
            w_spec = pl.BlockSpec((d_in, d_out_pad), lambda i: (0, 0))
            b_spec = pl.BlockSpec((1, d_out_pad), lambda i: (0, 0))
        return pl.pallas_call(
            _mlp_fast_kernel,
            out_shape=jax.ShapeDtypeStruct((n_pad, d_out_pad), out_dtype),
            grid=(n_tiles,),
            in_specs=[pl.BlockSpec((tm, d_in), lambda i: (i, 0)),  # row-tiled x
                      w_spec, b_spec],
            out_specs=pl.BlockSpec((tm, d_out_pad), lambda i: (i, 0)),
            compiler_params=pltpu.CompilerParams(
                dimension_semantics=("parallel",),
                vmem_limit_bytes=vmem_limit,
            ),
            cost_estimate=cost,
        )(x_p, w_p, b_p)

    try:
        return call(True)
    except Exception:
        # Fallback if this jax build rejects pipeline_mode / Buffered(1):
        # identical math, just default double-buffering of the resident weight.
        return call(False)


# --------------------------------------------------------------------------
# Large-weight path: class-tiled grid + online (flash-style) logsumexp.
# --------------------------------------------------------------------------
def _mlp_tiled_kernel(x_ref, w_ref, b_ref, o_ref, m_sc, l_sc):
    # x_ref: [tm, D_in] f32 (row-resident); w_ref: [D_in, tn] bf16;
    # b_ref: [1, tn] f32; o_ref: [tm, nk, tn] f32 (row-resident accumulator);
    # m_sc / l_sc: [tm, 1] f32 online-logsumexp state.
    k = pl.program_id(1)

    @pl.when(k == 0)
    def _():
        m_sc[...] = jnp.full(m_sc.shape, -jnp.inf, dtype=m_sc.dtype)
        l_sc[...] = jnp.zeros(l_sc.shape, dtype=l_sc.dtype)

    x = x_ref[...].astype(jnp.bfloat16)
    logits = jnp.dot(x, w_ref[...],
                     preferred_element_type=jnp.float32) + b_ref[...]

    m_prev = m_sc[...]
    m_new = jnp.maximum(m_prev, jnp.max(logits, axis=-1, keepdims=True))
    l_sc[...] = (l_sc[...] * jnp.exp(m_prev - m_new)
                 + jnp.sum(jnp.exp(logits - m_new), axis=-1, keepdims=True))
    m_sc[...] = m_new

    # Stash this class block's raw logits into the row-resident output.
    o_ref[:, pl.ds(k, 1), :] = logits[:, None, :].astype(o_ref.dtype)

    @pl.when(k == pl.num_programs(1) - 1)
    def _():
        lse = (m_sc[...] + jnp.log(l_sc[...]))[:, :, None]     # [tm, 1, 1]
        o_ref[...] = o_ref[...] - lse


def _mlp_tiled(x, weight, bias, n, d_in, d_out, align, budget, out_dtype,
               class_tile_cap):
    # Class tile tn: the double-buffered bf16 [D_in, tn] weight block should
    # use at most ~1/3 of the budget.
    tn_cap = budget // (12 * max(d_in, 1))
    tn_cap = max(align, min(4096, (tn_cap // align) * align))
    if class_tile_cap is not None:                 # test / override hook
        tn_cap = max(128, min(tn_cap, (class_tile_cap // 128) * 128))
        align = 128
    nk = max(1, _cdiv(d_out, tn_cap))
    tn = _round_up(_cdiv(d_out, nk), align)        # balanced class tiles
    nk = _cdiv(d_out, tn)
    d_out_pad = nk * tn

    # Row tile tm from what remains after the streamed weight/bias tiles.
    w_tile_bytes = 2 * d_in * tn * 2
    b_tile_bytes = 2 * tn * 4
    per_row = (2 * 4 * d_in + 2 * d_in            # x double-buffer + bf16 copy
               + 2 * 4 * d_out_pad                # row-resident output block
               + 3 * 4 * tn                       # logits / exp temporaries
               + 2 * 4 * 128)                     # m/l scratch (lane padding)
    avail = max(budget - w_tile_bytes - b_tile_bytes, 8 * per_row)
    tm_cap = max(8, min(1024, (avail // per_row) // 8 * 8))

    min_tiles = max(1, min(8, _cdiv(n, 256)))
    n_row_tiles = max(_cdiv(n, tm_cap), min_tiles)
    tm = _round_up(_cdiv(n, n_row_tiles), 8)
    n_row_tiles = _cdiv(n, tm)
    n_pad = n_row_tiles * tm

    x_p = jnp.pad(x, ((0, n_pad - n), (0, 0))) if n_pad != n else x
    w_p = jnp.pad(weight.astype(jnp.bfloat16).T,
                  ((0, 0), (0, d_out_pad - d_out)))
    b_p = jnp.full((1, d_out_pad), -1e30, dtype=jnp.float32)
    b_p = b_p.at[0, :d_out].set(bias.astype(jnp.float32))

    footprint = w_tile_bytes + b_tile_bytes + tm * per_row
    vmem_limit = int(min(budget, max(footprint + (4 << 20), 32 << 20)))

    cost = pl.CostEstimate(
        flops=2 * n_pad * d_in * d_out_pad,
        transcendentals=n_pad * (d_out_pad + nk),
        bytes_accessed=(x_p.size * 4 + n_row_tiles * w_p.size * 2
                        + b_p.size * 4 + n_pad * d_out_pad * 4),
    )

    out3 = pl.pallas_call(
        _mlp_tiled_kernel,
        out_shape=jax.ShapeDtypeStruct((n_pad, nk, tn), jnp.float32),
        grid=(n_row_tiles, nk),
        in_specs=[
            pl.BlockSpec((tm, d_in), lambda i, k: (i, 0)),   # row-resident x
            pl.BlockSpec((d_in, tn), lambda i, k: (0, k)),   # class-tiled W^T
            pl.BlockSpec((1, tn), lambda i, k: (0, k)),      # class-tiled bias
        ],
        out_specs=pl.BlockSpec((tm, nk, tn), lambda i, k: (i, 0, 0)),
        scratch_shapes=[pltpu.VMEM((tm, 1), jnp.float32),    # running max
                        pltpu.VMEM((tm, 1), jnp.float32)],   # running sum
        compiler_params=pltpu.CompilerParams(
            dimension_semantics=("parallel", "arbitrary"),
            vmem_limit_bytes=vmem_limit,
        ),
        cost_estimate=cost,
    )(x_p, w_p, b_p)

    return out3.reshape(n_pad, d_out_pad).astype(out_dtype)


# --------------------------------------------------------------------------
# Public wrapper (matches MLP.forward: log_softmax(x @ W.T + b, dim=1)).
# --------------------------------------------------------------------------
def mlp_forward(x, weight, bias, *, out_dtype=jnp.float32,
                force_tiled=False, class_tile_cap=None):
    """x: [N, D_in] f32; weight: [D_out, D_in] (PyTorch layout); bias: [D_out]."""
    n, d_in = x.shape
    d_out = weight.shape[0]
    assert weight.shape[1] == d_in

    budget = _vmem_budget_bytes()
    align = 128 if d_out <= 128 else 256          # 256 fills v6e/v7x MXU
    d_out_pad = _round_up(d_out, align)

    w_bytes = d_in * d_out_pad * 2                # bf16 resident, 1 buffer
    resident_fits = (w_bytes + 4 * d_out_pad
                     + 8 * _fast_per_row_bytes(d_in, d_out_pad)) <= budget

    if resident_fits and not force_tiled:
        out = _mlp_fast(x, weight, bias, n, d_in, d_out, d_out_pad,
                        budget, out_dtype)
    else:
        out = _mlp_tiled(x, weight, bias, n, d_in, d_out, align,
                         budget, out_dtype, class_tile_cap)
    return out[:n, :d_out]


if __name__ == "__main__":
    key = jax.random.PRNGKey(0)
    k1, k2, k3, k4 = jax.random.split(key, 4)

    def ref_f32(x, w, b):
        return jax.nn.log_softmax(x @ w.T + b, axis=1)

    def ref_bf16(x, w, b):
        logits = jnp.dot(x.astype(jnp.bfloat16), w.T.astype(jnp.bfloat16),
                         preferred_element_type=jnp.float32) + b
        return jax.nn.log_softmax(logits, axis=1)

    # --- Case 1: module-sized shapes (init_weights: std=0.01 W, zero bias). ---
    batch, d_in, d_out = 8, 32, 16
    x1 = jax.random.normal(k1, (batch, d_in), jnp.float32)
    w1 = 0.01 * jax.random.normal(k2, (d_out, d_in), jnp.float32)
    b1 = jnp.zeros((d_out,), jnp.float32)
    o1 = jax.block_until_ready(mlp_forward(x1, w1, b1))
    assert o1.shape == (batch, d_out)
    assert jnp.allclose(o1, ref_bf16(x1, w1, b1), atol=1e-3, rtol=1e-3)
    assert jnp.allclose(o1, ref_f32(x1, w1, b1), atol=2e-2, rtol=0.0)

    # --- Case 2: multi-row-tile fast path (balanced tiles + row padding). ---
    n2, di2, do2 = 300, 128, 40
    x2 = jax.random.normal(k3, (n2, di2), jnp.float32)
    w2 = 0.01 * jax.random.normal(k4, (do2, di2), jnp.float32)
    b2 = 0.01 * jnp.arange(do2, dtype=jnp.float32)
    o2 = jax.block_until_ready(mlp_forward(x2, w2, b2))
    assert o2.shape == (n2, do2)
    assert jnp.allclose(o2, ref_bf16(x2, w2, b2), atol=1e-3, rtol=1e-3)
    assert jnp.allclose(o2, ref_f32(x2, w2, b2), atol=2e-2, rtol=0.0)

    # --- Case 3: class-tiled online-logsumexp path (forced, small config). ---
    n3, di3, do3 = 20, 64, 300
    x3 = jax.random.normal(k1, (n3, di3), jnp.float32)
    w3 = 0.01 * jax.random.normal(k2, (do3, di3), jnp.float32)
    b3 = 0.01 * jnp.arange(do3, dtype=jnp.float32)
    o3 = jax.block_until_ready(
        mlp_forward(x3, w3, b3, force_tiled=True, class_tile_cap=128))
    assert o3.shape == (n3, do3)
    assert jnp.allclose(o3, ref_bf16(x3, w3, b3), atol=1e-3, rtol=1e-3)
    assert jnp.allclose(o3, ref_f32(x3, w3, b3), atol=2e-2, rtol=0.0)

    print("KERNEL_OK")
</pallas_src>

<mosaic_0001>
module attributes {stable_mosaic.version = 11 : i64} {
  func.func @_mlp_fast_kernel(%arg0: i32, %arg1: memref<8x32xf32, #tpu.memory_space<vmem>>, %arg2: memref<32x128xbf16, #tpu.memory_space<vmem>>, %arg3: memref<1x128xf32, #tpu.memory_space<vmem>>, %arg4: memref<8x128xf32, #tpu.memory_space<vmem>>) attributes {dimension_semantics = [#tpu.dimension_semantics<parallel>], iteration_bounds = array<i64: 1>, scalar_prefetch = 0 : i64, scratch_operands = 0 : i64, tpu.core_type = #tpu.core_type<tc>, window_params = [{transform_indices = @transform_0, window_bounds = array<i64: 8, 32>}, {pipeline_mode = #tpu.pipeline_mode<synchronous>, transform_indices = @transform_1, window_bounds = array<i64: 32, 128>}, {pipeline_mode = #tpu.pipeline_mode<synchronous>, transform_indices = @transform_2, window_bounds = array<i64: 1, 128>}, {transform_indices = @transform_3, window_bounds = array<i64: 8, 128>}]} {
    %c0 = arith.constant 0 : index
    %c0_0 = arith.constant 0 : index
    %0 = vector.load %arg1[%c0, %c0_0] : memref<8x32xf32, #tpu.memory_space<vmem>>, vector<8x32xf32>
    %1 = arith.truncf %0 : vector<8x32xf32> to vector<8x32xbf16>
    %c0_1 = arith.constant 0 : index
    %c0_2 = arith.constant 0 : index
    %2 = vector.load %arg2[%c0_1, %c0_2] : memref<32x128xbf16, #tpu.memory_space<vmem>>, vector<32x128xbf16>
    %cst = arith.constant dense<0.000000e+00> : vector<8x128xf32>
    %3 = tpu.matmul %1, %2, %cst {dimension_numbers = #tpu.dot_dimension_numbers<[1], [0], [0], [1], [0, 0, 1, 1], [], []>} : vector<8x32xbf16>, vector<32x128xbf16>, vector<8x128xf32> -> vector<8x128xf32>
    %c0_3 = arith.constant 0 : index
    %c0_4 = arith.constant 0 : index
    %4 = vector.load %arg3[%c0_3, %c0_4] : memref<1x128xf32, #tpu.memory_space<vmem>>, vector<1x128xf32>
    %5 = vector.broadcast %4 : vector<1x128xf32> to vector<8x128xf32>
    %6 = arith.addf %3, %5 : vector<8x128xf32>
    %cst_5 = arith.constant dense<0xFF800000> : vector<8xf32>
    %7 = vector.multi_reduction <maximumf>, %6, %cst_5 [1] : vector<8x128xf32> to vector<8xf32>
    %8 = vector.shape_cast %7 : vector<8xf32> to vector<8x1xf32>
    %9 = vector.broadcast %8 : vector<8x1xf32> to vector<8x128xf32>
    %10 = arith.subf %6, %9 : vector<8x128xf32>
    %11 = math.exp %10 : vector<8x128xf32>
    %cst_6 = arith.constant dense<0.000000e+00> : vector<8xf32>
    %12 = vector.multi_reduction <add>, %11, %cst_6 [1] : vector<8x128xf32> to vector<8xf32>
    %13 = vector.shape_cast %12 : vector<8xf32> to vector<8x1xf32>
    %14 = math.log %13 : vector<8x1xf32>
    %15 = arith.addf %8, %14 : vector<8x1xf32>
    %16 = vector.broadcast %15 : vector<8x1xf32> to vector<8x128xf32>
    %17 = arith.subf %6, %16 : vector<8x128xf32>
    %c0_7 = arith.constant 0 : index
    %c0_8 = arith.constant 0 : index
    %18 = vector.load %arg4[%c0_7, %c0_8] : memref<8x128xf32, #tpu.memory_space<vmem>>, vector<8x128xf32>
    tpu.vector_store %arg4[%c0_7, %c0_8], %17 {strides = array<i32>} : memref<8x128xf32, #tpu.memory_space<vmem>>, vector<8x128xf32>,
    return
  }
  func.func @transform_0(%arg0: i32) -> (i32, i32) {
    %c0_i32 = arith.constant 0 : i32
    %c0_i32_0 = arith.constant 0 : i32
    return %arg0, %c0_i32 : i32, i32
  }
  func.func @transform_1(%arg0: i32) -> (i32, i32) {
    %c0_i32 = arith.constant 0 : i32
    %c0_i32_0 = arith.constant 0 : i32
    %c0_i32_1 = arith.constant 0 : i32
    return %c0_i32, %c0_i32_0 : i32, i32
  }
  func.func @transform_2(%arg0: i32) -> (i32, i32) {
    %c0_i32 = arith.constant 0 : i32
    %c0_i32_0 = arith.constant 0 : i32
    %c0_i32_1 = arith.constant 0 : i32
    return %c0_i32, %c0_i32_0 : i32, i32
  }
  func.func @transform_3(%arg0: i32) -> (i32, i32) {
    %c0_i32 = arith.constant 0 : i32
    %c0_i32_0 = arith.constant 0 : i32
    return %arg0, %c0_i32 : i32, i32
  }
}

module attributes {stable_mosaic.version = 11 : i64} {
  func.func @_mlp_fast_kernel(%arg0: i32, %arg1: memref<8x32xf32, #tpu.memory_space<vmem>>, %arg2: memref<32x128xbf16, #tpu.memory_space<vmem>>, %arg3: memref<1x128xf32, #tpu.memory_space<vmem>>, %arg4: memref<8x128xf32, #tpu.memory_space<vmem>>) attributes {dimension_semantics = [#tpu.dimension_semantics<parallel>], iteration_bounds = array<i64: 1>, scalar_prefetch = 0 : i64, scratch_operands = 0 : i64, tpu.core_type = #tpu.core_type<tc>, window_params = [{transform_indices = @transform_0, window_bounds = array<i64: 8, 32>}, {pipeline_mode = #tpu.pipeline_mode<synchronous>, transform_indices = @transform_1, window_bounds = array<i64: 32, 128>}, {pipeline_mode = #tpu.pipeline_mode<synchronous>, transform_indices = @transform_2, window_bounds = array<i64: 1, 128>}, {transform_indices = @transform_3, window_bounds = array<i64: 8, 128>}]} {
    %c0 = arith.constant 0 : index
    %c0_0 = arith.constant 0 : index
    %0 = vector.load %arg1[%c0, %c0_0] : memref<8x32xf32, #tpu.memory_space<vmem>>, vector<8x32xf32>
    %1 = arith.truncf %0 : vector<8x32xf32> to vector<8x32xbf16>
    %c0_1 = arith.constant 0 : index
    %c0_2 = arith.constant 0 : index
    %2 = vector.load %arg2[%c0_1, %c0_2] : memref<32x128xbf16, #tpu.memory_space<vmem>>, vector<32x128xbf16>
    %cst = arith.constant dense<0.000000e+00> : vector<8x128xf32>
    %3 = tpu.matmul %1, %2, %cst {dimension_numbers = #tpu.dot_dimension_numbers<[1], [0], [0], [1], [0, 0, 1, 1], [], []>} : vector<8x32xbf16>, vector<32x128xbf16>, vector<8x128xf32> -> vector<8x128xf32>
    %c0_3 = arith.constant 0 : index
    %c0_4 = arith.constant 0 : index
    %4 = vector.load %arg3[%c0_3, %c0_4] : memref<1x128xf32, #tpu.memory_space<vmem>>, vector<1x128xf32>
    %5 = vector.broadcast %4 : vector<1x128xf32> to vector<8x128xf32>
    %6 = arith.addf %3, %5 : vector<8x128xf32>
    %cst_5 = arith.constant dense<0xFF800000> : vector<8xf32>
    %7 = vector.multi_reduction <maximumf>, %6, %cst_5 [1] : vector<8x128xf32> to vector<8xf32>
    %8 = vector.shape_cast %7 : vector<8xf32> to vector<8x1xf32>
    %9 = vector.broadcast %8 : vector<8x1xf32> to vector<8x128xf32>
    %10 = arith.subf %6, %9 : vector<8x128xf32>
    %11 = math.exp %10 : vector<8x128xf32>
    %cst_6 = arith.constant dense<0.000000e+00> : vector<8xf32>
    %12 = vector.multi_reduction <add>, %11, %cst_6 [1] : vector<8x128xf32> to vector<8xf32>
    %13 = vector.shape_cast %12 : vector<8xf32> to vector<8x1xf32>
    %14 = math.log %13 : vector<8x1xf32>
    %15 = arith.addf %8, %14 : vector<8x1xf32>
    %16 = vector.broadcast %15 : vector<8x1xf32> to vector<8x128xf32>
    %17 = arith.subf %6, %16 : vector<8x128xf32>
    %c0_7 = arith.constant 0 : index
    %c0_8 = arith.constant 0 : index
    %18 = vector.load %arg4[%c0_7, %c0_8] : memref<8x128xf32, #tpu.memory_space<vmem>>, vector<8x128xf32>
    tpu.vector_store %arg4[%c0_7, %c0_8], %17 {strides = array<i32>} : memref<8x128xf32, #tpu.memory_space<vmem>>, vector<8x128xf32>,
    return
  }
  func.func @transform_0(%arg0: i32) -> (i32, i32) {
    %c0_i32 = arith.constant 0 : i32
    %c0_i32_0 = arith.constant 0 : i32
    return %arg0, %c0_i32 : i32, i32
  }
  func.func @transform_1(%arg0: i32) -> (i32, i32) {
    %c0_i32 = arith.constant 0 : i32
    %c0_i32_0 = arith.constant 0 : i32
    %c0_i32_1 = arith.constant 0 : i32
    return %c0_i32, %c0_i32_0 : i32, i32
  }
  func.func @transform_2(%arg0: i32) -> (i32, i32) {
    %c0_i32 = arith.constant 0 : i32
    %c0_i32_0 = arith.constant 0 : i32
    %c0_i32_1 = arith.constant 0 : i32
    return %c0_i32, %c0_i32_0 : i32, i32
  }
  func.func @transform_3(%arg0: i32) -> (i32, i32) {
    %c0_i32 = arith.constant 0 : i32
    %c0_i32_0 = arith.constant 0 : i32
    return %arg0, %c0_i32 : i32, i32
  }
}

</mosaic_0001>

<bundles_post_ra>
// kernel: tpu_custom_call.1
= control target key start
LH: loop header
LB: loop body
LE: loop exit
PB: predicated region body
PF: predicated region fallthrough
CT: control target
= control target key end

     0   :  { %8 = vsyncpa [#allocation3], 0  ;;  %s251_s0 = inlined_call_operand.hbm [shape: f32[8,32], index: 0, kind: input, shape index: {}]   ;;  %s252_s1 = inlined_call_operand.hbm [shape: bf16[32,128], index: 1, kind: input, shape index: {}]   ;;  %s253_s2 = inlined_call_operand.vmem [shape: f32[1,128], index: 2, kind: input, shape index: {}]   ;;  %s254_s3 = inlined_call_operand.hbm [shape: f32[8,128], index: 3, kind: output, shape index: {}]  }
   0x1   :  { %9 = vsyncpa [#allocation6], 0 }
   0x2   :  { %10 = vsyncpa [#allocation4], 0  ;;  %s16_s14 = sshll.u32 %s251_s0, 4  ;;  %s214_s15 = smov [#allocation2]   ;;  %s17_s14 = int_to_ptr.hbm [resolvable:$true] %s16_s14 }
   0x3   :  { %s18_s16 = sshll.u32 %s214_s15, 4  ;;  %s26_s19 = sshll.u32 %s252_s1, 4  ;;  %s19_s16 = int_to_ptr.vmem [resolvable:$true] %s18_s16  ;;  %s27_s19 = int_to_ptr.hbm [resolvable:$true] %s26_s19 }
   0x4   :  { %21 = dma.hbm_to_vmem [thread:$0]  %s17_s14, 128, %s19_s16, [#allocation3]  }
   0x5   :  { %s215_s20 = smov [#allocation5]   ;;  %s216_s22 = smov 64  }
   0x6   :  { %s28_s21 = sshll.u32 %s215_s20, 4  ;;  %s217_s23 = smov 4   ;;  %s29_s21 = int_to_ptr.vmem [resolvable:$true] %s28_s21 }
   0x7   :  { %34 = dma.hbm_to_vmem [thread:$0]  %s27_s19, 256, %s29_s21, [#allocation6], %s216_s22, %s216_s22, %s217_s23  }
   0x8   :  { %208 = dma.done.wait [#allocation3], 128  }
   0x9   :  { %209 = vsyncadd [#allocation3], 4294967168 }
   0xa   :  { %210 = dma.done.wait [#allocation6], 256  }
   0xb   :  { %211 = vsyncadd [#allocation6], 4294967040  ;;  %v125_v0 = vld [vmem:[#allocation5 + $0x8] sm:$0xff]  ;;  %v124_v1 = vld [vmem:[#allocation5] sm:$0xff]  ;;  %vm68_vm0 = vcmask 261120   ;;  %s218_s24 = smov [#allocation7]  }
   0xc   :  { %78 = vmatpush.bf16.msra.mxu0 %v125_v0  ;;  %v46_v2 = vld [vmem:[#allocation2] sm:$0xff]  ;;  %s102_s25 = sshll.u32 %s218_s24, 4  ;;  %s103_s25 = int_to_ptr.vmem [resolvable:$true] %s102_s25 }
   0xd   :  { %v47_v3 = vpack.c.bf16 %v46_v2, %v46_v2  ;;  %v131_v4 = vld [vmem:[%s253_s2] ss:$0 sm:$0xff]  ;;  %s104_s2 = sshll.u32 %s254_s3, 4  ;;  %s105_s2 = int_to_ptr.hbm [resolvable:$true] %s104_s2 }
  0x10   :  { %79 = vmatpush.bf16.msra.mxu0 %v124_v1 }
  0x13   :  { %123 = vmatmul.msk.bf16.vlgmr.msra.gmra.mxu0 %vm68_vm0, %v47_v3 }
  0x90   :  { %v81_v5 = vpop.f32.mrf.mxu0 }
  0x91   :  { %v82_v6 = vadd.f32 %v131_v4, %v81_v5 }
  0x93   :  { %85 = vmax.xlane.f32.xlu0 %v82_v6 }
  0x98   :  { %v83_v7 = vpop.f32.mrf.mxu0 }
 0x106   :  { %v86_v8 = vpop.xlane.xlu0 %85 }
 0x107   :  { %v87_v9 = vsub.f32 %v82_v6, %v86_v8 }
 0x109   :  { %v88_v10 = vmul.f32 1.442695, %v87_v9 }
 0x10b   :  { %132 = vpow2.f32 %v88_v10 }
 0x111   :  { %v133_v11 = vpop.eup %132 }
 0x112   :  { %90 = vadd.xlane.f32.xlu0 %v133_v11 }
 0x185   :  { %v91_v12 = vpop.xlane.xlu0 %90 }
 0x186   :  { %134 = vlog2.f32 %v91_v12 }
 0x18c   :  { %v135_v13 = vpop.eup %134 }
 0x18d   :  { %v93_v14 = vmul.f32 0.6931472, %v135_v13 }
 0x18f   :  { %v94_v15 = vadd.f32 %v93_v14, %v86_v8 }
 0x191   :  { %v95_v16 = vsub.f32 %v82_v6, %v94_v15 }
 0x193   :  { %96 = vst [vmem:[#allocation7] sm:$0xff] %v95_v16 }
 0x194   :  { %107 = dma.vmem_to_hbm [thread:$0]  %s103_s25, 128, %s105_s2, [#allocation4]  }
 0x195   :  { %212 = dma.done.wait [#allocation4], 128  }
 0x196   :  { %213 = vsyncadd [#allocation4], 4294967168 }
 0x197   :  { %112 = vsyncpa [#allocation3], 1 }
 0x198   :  { %113 = vsyncpa [#allocation6], 1 }
 0x199   :  { %114 = vsyncpa [#allocation4], 1 }

// kernel: tpu_custom_call.1
= control target key start
LH: loop header
LB: loop body
LE: loop exit
PB: predicated region body
PF: predicated region fallthrough
CT: control target
= control target key end

     0   :  { %8 = vsyncpa [#allocation3], 0  ;;  %s251_s0 = inlined_call_operand.hbm [shape: f32[8,32], index: 0, kind: input, shape index: {}]   ;;  %s252_s1 = inlined_call_operand.hbm [shape: bf16[32,128], index: 1, kind: input, shape index: {}]   ;;  %s253_s2 = inlined_call_operand.vmem [shape: f32[1,128], index: 2, kind: input, shape index: {}]   ;;  %s254_s3 = inlined_call_operand.hbm [shape: f32[8,128], index: 3, kind: output, shape index: {}]  }
   0x1   :  { %9 = vsyncpa [#allocation6], 0 }
   0x2   :  { %10 = vsyncpa [#allocation4], 0  ;;  %s16_s14 = sshll.u32 %s251_s0, 4  ;;  %s214_s15 = smov [#allocation2]   ;;  %s17_s14 = int_to_ptr.hbm [resolvable:$true] %s16_s14 }
   0x3   :  { %s18_s16 = sshll.u32 %s214_s15, 4  ;;  %s26_s19 = sshll.u32 %s252_s1, 4  ;;  %s19_s16 = int_to_ptr.vmem [resolvable:$true] %s18_s16  ;;  %s27_s19 = int_to_ptr.hbm [resolvable:$true] %s26_s19 }
   0x4   :  { %21 = dma.hbm_to_vmem [thread:$0]  %s17_s14, 128, %s19_s16, [#allocation3]  }
   0x5   :  { %s215_s20 = smov [#allocation5]   ;;  %s216_s22 = smov 64  }
   0x6   :  { %s28_s21 = sshll.u32 %s215_s20, 4  ;;  %s217_s23 = smov 4   ;;  %s29_s21 = int_to_ptr.vmem [resolvable:$true] %s28_s21 }
   0x7   :  { %34 = dma.hbm_to_vmem [thread:$0]  %s27_s19, 256, %s29_s21, [#allocation6], %s216_s22, %s216_s22, %s217_s23  }
   0x8   :  { %208 = dma.done.wait [#allocation3], 128  }
   0x9   :  { %209 = vsyncadd [#allocation3], 4294967168 }
   0xa   :  { %210 = dma.done.wait [#allocation6], 256  }
   0xb   :  { %211 = vsyncadd [#allocation6], 4294967040  ;;  %v125_v0 = vld [vmem:[#allocation5 + $0x8] sm:$0xff]  ;;  %v124_v1 = vld [vmem:[#allocation5] sm:$0xff]  ;;  %vm68_vm0 = vcmask 261120   ;;  %s218_s24 = smov [#allocation7]  }
   0xc   :  { %78 = vmatpush.bf16.msra.mxu0 %v125_v0  ;;  %v46_v2 = vld [vmem:[#allocation2] sm:$0xff]  ;;  %s102_s25 = sshll.u32 %s218_s24, 4  ;;  %s103_s25 = int_to_ptr.vmem [resolvable:$true] %s102_s25 }
   0xd   :  { %v47_v3 = vpack.c.bf16 %v46_v2, %v46_v2  ;;  %v131_v4 = vld [vmem:[%s253_s2] ss:$0 sm:$0xff]  ;;  %s104_s2 = sshll.u32 %s254_s3, 4  ;;  %s105_s2 = int_to_ptr.hbm [resolvable:$true] %s104_s2 }
  0x10   :  { %79 = vmatpush.bf16.msra.mxu0 %v124_v1 }
  0x13   :  { %123 = vmatmul.msk.bf16.vlgmr.msra.gmra.mxu0 %vm68_vm0, %v47_v3 }
  0x90   :  { %v81_v5 = vpop.f32.mrf.mxu0 }
  0x91   :  { %v82_v6 = vadd.f32 %v131_v4, %v81_v5 }
  0x93   :  { %85 = vmax.xlane.f32.xlu0 %v82_v6 }
  0x98   :  { %v83_v7 = vpop.f32.mrf.mxu0 }
 0x106   :  { %v86_v8 = vpop.xlane.xlu0 %85 }
 0x107   :  { %v87_v9 = vsub.f32 %v82_v6, %v86_v8 }
 0x109   :  { %v88_v10 = vmul.f32 1.442695, %v87_v9 }
 0x10b   :  { %132 = vpow2.f32 %v88_v10 }
 0x111   :  { %v133_v11 = vpop.eup %132 }
 0x112   :  { %90 = vadd.xlane.f32.xlu0 %v133_v11 }
 0x185   :  { %v91_v12 = vpop.xlane.xlu0 %90 }
 0x186   :  { %134 = vlog2.f32 %v91_v12 }
 0x18c   :  { %v135_v13 = vpop.eup %134 }
 0x18d   :  { %v93_v14 = vmul.f32 0.6931472, %v135_v13 }
 0x18f   :  { %v94_v15 = vadd.f32 %v93_v14, %v86_v8 }
 0x191   :  { %v95_v16 = vsub.f32 %v82_v6, %v94_v15 }
 0x193   :  { %96 = vst [vmem:[#allocation7] sm:$0xff] %v95_v16 }
 0x194   :  { %107 = dma.vmem_to_hbm [thread:$0]  %s103_s25, 128, %s105_s2, [#allocation4]  }
 0x195   :  { %212 = dma.done.wait [#allocation4], 128  }
 0x196   :  { %213 = vsyncadd [#allocation4], 4294967168 }
 0x197   :  { %112 = vsyncpa [#allocation3], 1 }
 0x198   :  { %113 = vsyncpa [#allocation6], 1 }
 0x199   :  { %114 = vsyncpa [#allocation4], 1 }

</bundles_post_ra>
